<compile_context>
chip_gen: v7x
topology: tpu7x:2x2x1
jax: 0.10.0
libtpu: 0.0.40
codegen_flags: <defaults>
</compile_context>

<pallas_src>
import functools

import numpy as np

import jax
import jax.numpy as jnp
from jax import lax
from jax.experimental import pallas as pl
from jax.experimental.pallas import tpu as pltpu


def _onehot_kernel(x_ref, out_ref, *, depth):
    # x_ref:   (tm, 1)     int32  -- one class index per row (flattened B*T)
    # out_ref: (tm, depth) f32/bf16
    idx = x_ref[...] % depth                                    # (tm, 1)
    lanes = lax.broadcasted_iota(jnp.int32, out_ref.shape, 1)   # (tm, depth)
    out_ref[...] = (idx == lanes).astype(out_ref.dtype)


def _sublane_granule(dtype):
    itemsize = np.dtype(dtype).itemsize
    if itemsize >= 4:
        return 8
    if itemsize == 2:
        return 16
    return 32


def _round_up(v, m):
    return ((v + m - 1) // m) * m


def _choose_tm(BT, depth, dtype, vmem_target_bytes, tm_cap=4096):
    """Largest sublane-aligned row tile whose double-buffered footprint fits."""
    granule = _sublane_granule(dtype)
    out_bytes = np.dtype(dtype).itemsize
    # Per-row double-buffered VMEM: output block + (tm, 1) int32 input block,
    # which is lane-padded to (tm, 128) in VMEM (128 * 4 B per row).
    per_row = 2 * depth * out_bytes + 2 * 128 * 4
    tm = max(granule, vmem_target_bytes // per_row)
    tm = min(tm, tm_cap)
    if tm >= BT:
        # Whole problem fits one tile: split it so the grid has >= 2 steps and
        # both v7x TensorCores get a share of the (parallel) row axis.
        if BT >= 2 * granule:
            half = _round_up(pl.cdiv(BT, 2), granule)
            tm = half if half < BT else BT
        else:
            tm = BT
    else:
        tm = (tm // granule) * granule
    return tm


def one_hot(x, depth, *, dtype=jnp.float32, tm=None,
            vmem_target_bytes=16 << 20):
    """x: (B, T) integer array -> (B, T, depth) one-hot (default float32)."""
    B, T = x.shape
    BT = B * T
    xr = x.reshape(BT, 1).astype(jnp.int32)

    granule = _sublane_granule(dtype)
    if tm is None:
        tm = _choose_tm(BT, depth, dtype, vmem_target_bytes)
    else:
        tm = min(tm, BT)
        if tm < BT:
            tm = max(granule, (tm // granule) * granule)

    grid = (pl.cdiv(BT, tm),)

    # Explicit scoped-VMEM limit: raises v5e's 16 MiB default, stays inside
    # v7x's 64 MiB physical VMEM.
    in_block_bytes = tm * 128 * 4                       # lane-padded (tm,1) int32
    out_block_bytes = tm * depth * np.dtype(dtype).itemsize
    vmem_needed = 2 * (in_block_bytes + out_block_bytes) + (2 << 20)
    vmem_limit = int(min(max(vmem_needed, 32 << 20), 48 << 20))

    out = pl.pallas_call(
        functools.partial(_onehot_kernel, depth=depth),
        out_shape=jax.ShapeDtypeStruct((BT, depth), dtype),
        grid=grid,
        in_specs=[pl.BlockSpec((tm, 1), lambda i: (i, 0))],
        out_specs=pl.BlockSpec((tm, depth), lambda i: (i, 0)),
        compiler_params=pltpu.CompilerParams(
            # Row axis is embarrassingly parallel; if a v7x profile shows one
            # idle TensorCore, pltpu.CORE_PARALLEL is the next thing to try.
            dimension_semantics=("parallel",),
            vmem_limit_bytes=vmem_limit),
    )(xr)
    return out.reshape(B, T, depth)


def one_hot_reference(x, depth):
    return jax.nn.one_hot(x % depth, depth, dtype=jnp.float32)


if __name__ == "__main__":
    key = jax.random.PRNGKey(0)

    # Main case: lane-dense depth (multiple of 128, mu-law style 256); values
    # exceed depth to exercise the `x % depth` wrap-around like the module.
    B, T, depth = 2, 16, 256
    x = jax.random.randint(key, (B, T), 0, 1024, dtype=jnp.int32)

    fn = jax.jit(functools.partial(one_hot, depth=depth))
    y = jax.block_until_ready(fn(x))
    assert y.shape == (B, T, depth) and y.dtype == jnp.float32
    assert jnp.array_equal(y, one_hot_reference(x, depth)), "mismatch vs reference"

    # Ragged case: B*T (=39) is not a multiple of the chosen tile; exercises
    # the pl.cdiv grid + clipped writeback path (the last block reads OOB
    # input rows, safe because each output row depends only on its own input
    # row).  Negative inputs exercise floor-mod wrap-around.
    B2, T2, depth2 = 3, 13, 128
    x2 = jax.random.randint(jax.random.PRNGKey(1), (B2, T2), -5, 500,
                            dtype=jnp.int32)
    y2 = jax.block_until_ready(one_hot(x2, depth2))
    assert y2.shape == (B2, T2, depth2)
    assert jnp.array_equal(y2, one_hot_reference(x2, depth2)), "ragged mismatch"

    # bf16 output path (exact for 0/1 values; halves HBM-write bytes).
    y3 = jax.block_until_ready(one_hot(x, depth, dtype=jnp.bfloat16))
    assert y3.dtype == jnp.bfloat16
    assert jnp.array_equal(y3.astype(jnp.float32), one_hot_reference(x, depth)), \
        "bf16 mismatch"

    print("KERNEL_OK")
</pallas_src>

<mosaic_0001>
module attributes {stable_mosaic.version = 11 : i64} {
  func.func @_onehot_kernel(%arg0: i32, %arg1: memref<16x1xi32, #tpu.memory_space<vmem>>, %arg2: memref<16x256xf32, #tpu.memory_space<vmem>>) attributes {dimension_semantics = [#tpu.dimension_semantics<parallel>], iteration_bounds = array<i64: 2>, scalar_prefetch = 0 : i64, scratch_operands = 0 : i64, tpu.core_type = #tpu.core_type<tc>, window_params = [{transform_indices = @transform_0, window_bounds = array<i64: 16, 1>}, {transform_indices = @transform_1, window_bounds = array<i64: 16, 256>}]} {
    %c0 = arith.constant 0 : index
    %c0_0 = arith.constant 0 : index
    %0 = vector.load %arg1[%c0, %c0_0] : memref<16x1xi32, #tpu.memory_space<vmem>>, vector<16x1xi32>
    %c256_i32 = arith.constant 256 : i32
    %c0_i32 = arith.constant 0 : i32
    %1 = arith.cmpi eq, %c256_i32, %c0_i32 : i32
    %c1_i32 = arith.constant 1 : i32
    %2 = arith.select %1, %c1_i32, %c256_i32 : i32
    %3 = vector.broadcast %2 : i32 to vector<16x1xi32>
    %4 = arith.remsi %0, %3 : vector<16x1xi32>
    %c0_i32_1 = arith.constant 0 : i32
    %5 = vector.broadcast %c0_i32_1 : i32 to vector<16x1xi32>
    %6 = arith.cmpi ne, %4, %5 : vector<16x1xi32>
    %c0_i32_2 = arith.constant 0 : i32
    %7 = vector.broadcast %c0_i32_2 : i32 to vector<16x1xi32>
    %8 = arith.cmpi slt, %4, %7 : vector<16x1xi32>
    %c0_i32_3 = arith.constant 0 : i32
    %9 = arith.cmpi slt, %2, %c0_i32_3 : i32
    %10 = vector.broadcast %9 : i1 to vector<16x1xi1>
    %11 = vector.broadcast %10 : vector<16x1xi1> to vector<16x1xi1>
    %12 = arith.xori %8, %11 : vector<16x1xi1>
    %13 = arith.andi %12, %6 : vector<16x1xi1>
    %14 = vector.broadcast %2 : i32 to vector<16x1xi32>
    %15 = arith.addi %4, %14 : vector<16x1xi32>
    %16 = arith.select %13, %15, %4 : vector<16x1xi1>, vector<16x1xi32>
    %17 = tpu.iota {dimensions = array<i32: 1>} : vector<16x256xi32>
    %18 = vector.broadcast %16 : vector<16x1xi32> to vector<16x256xi32>
    %19 = arith.cmpi eq, %18, %17 : vector<16x256xi32>
    %20 = arith.extui %19 : vector<16x256xi1> to vector<16x256xi32>
    %21 = arith.sitofp %20 : vector<16x256xi32> to vector<16x256xf32>
    %c0_4 = arith.constant 0 : index
    %c0_5 = arith.constant 0 : index
    %22 = vector.load %arg2[%c0_4, %c0_5] : memref<16x256xf32, #tpu.memory_space<vmem>>, vector<16x256xf32>
    tpu.vector_store %arg2[%c0_4, %c0_5], %21 {strides = array<i32>} : memref<16x256xf32, #tpu.memory_space<vmem>>, vector<16x256xf32>,
    return
  }
  func.func @transform_0(%arg0: i32) -> (i32, i32) {
    %c0_i32 = arith.constant 0 : i32
    %c0_i32_0 = arith.constant 0 : i32
    return %arg0, %c0_i32 : i32, i32
  }
  func.func @transform_1(%arg0: i32) -> (i32, i32) {
    %c0_i32 = arith.constant 0 : i32
    %c0_i32_0 = arith.constant 0 : i32
    return %arg0, %c0_i32 : i32, i32
  }
}

</mosaic_0001>

<bundles_post_ra>
// kernel: one_hot.1
= control target key start
LH: loop header
LB: loop body
LE: loop exit
PB: predicated region body
PF: predicated region fallthrough
CT: control target
= control target key end

     0   :  { %6 = vsyncpa [#allocation3], 0  ;;  %s492_s0 = inlined_call_operand.vmem [shape: s32[32,1], index: 0, kind: input, shape index: {}]   ;;  %s493_s1 = inlined_call_operand.hbm [shape: f32[32,256], index: 1, kind: output, shape index: {}]  }
   0x1   :  { %8 = vsyncpa [#allocation3 + $0x1], 0  ;;  %s390_s6 = smov 0   ;;  %s392_s7 = smov 0  }
   0x2   :  { %s394_s8 = smov 0   ;;  %s396_s9 = smov 0  }
   0x3 LB: > { %s411_s10 = sadd.s32 4294967295, %s373_s9   ;;  %s246_s11 = sadd.s32 4294967294, %s373_s9   ;;  %s373_s9 = sphi %s396_s9, %s499_s9   ;;  %s369_s8 = sphi %s394_s8, %s498_s8   ;;  %s365_s7 = sphi %s392_s7, %s497_s7   ;;  %s361_s6 = sphi %s390_s6, %s496_s6  }
   0x4   : > { %s415_s12 = sadd.s32 1, %s373_s9   ;;  %s47_s13 = sadd.s32 1, %s369_s8 }
   0x5   : > { %s44_s14 = ssub.s32 %s373_s9, %s415_s12  ;;  %p57_p0 = scmp.ne.s32.totalorder %s369_s8, %s365_s7 }
   0x6   : > { %p45_p1 = scmp.eq.s32.totalorder %s44_s14, 0  ;;  %p58_p2 = scmp.eq.s32.totalorder %s411_s10, 1 }
   0x7   : > { %p63_p3 = scmp.ne.s32.totalorder %s365_s7, %s361_s6  ;;  %p64_p4 = scmp.eq.s32.totalorder %s246_s11, 1 }
   0x8   : > { %s426_s15 = scalar_select %p45_p1, %s369_s8, %s47_s13  }
   0x9   : > { %p428_p5 = por %p58_p2, %p57_p0  ;;  %p432_p6 = por %p64_p4, %p63_p3 }
   0xa   : > { %p249_p7 = scmp.ge.s32.totalorder %s373_s9, 1  ;;  %p91_p8 = scmp.lt.s32.totalorder %s373_s9, 3 }
   0xc   : > { %p92_p9 = pnand %p249_p7, %p91_p8 }
   0xd   : > { %s251_s18 = sshll.u32 (!%p92_p9), %s411_s10, 1  ;;  %v375_v0 = vmov (!%p92_p9), 0   ;;  %v144_v17 = vlaneseq (!%p92_p9)  ;;  %s108_s23 = sand.u32 (!%p92_p9), 1, %s365_s7   ;;  %v376_v21 = vmov (!%p92_p9), 0.0  }
   0xe   : > { %95 = sbr.rel (%p92_p9) target bundleno = 186 (0xba), region = 24  ;;  %310 = vset.pattern.permute.xlu0 (!%p92_p9), %v375_v0  ;;  %p112_p10 = scmp.lt.s32.totalorder (!%p92_p9), %s251_s18, 3 }
   0xf   : > { %v145_v18 = vand.u32 (!%p92_p9), 127, %v144_v17  ;;  %s250_s24 = sshll.u32 (!%p92_p9), %s108_s23, 5  ;;  %s266_s27 = sshll.u32 (!%p92_p9), %s411_s10, 9 }
  0x10   : > { %s110_s25 = scalar_lea.vmem (!%p92_p9), [#allocation2], %s250_s24  ;;  %s449_s30 = scalar_lea.hbm (!%p92_p9), %s493_s1, %s266_s27 }
  0x11   : > { %v146_v19 = vadd.s32 (!%p92_p9), 128, %v145_v18  ;;  %s184_s26 = sshll.u32 (!%p92_p9), %s110_s25, 4  ;;  %s451_s2 = scalar_lea.sflag (!%p92_p9), [#allocation3], %s108_s23  ;;  %s444_s26 = int_to_ptr.vmem [resolvable:$true] %s184_s26 }
  0x12   : > { %s311_s3 = scalar_lea.vmem (!%p92_p9), %s444_s26, 512  ;;  %s377_s4 = smov (!%p92_p9), [#allocation2]  }
  0x13   : > { %p312_p11 = scmp.ne.s32.totalorder (!%p92_p9), %s444_s26, %s311_s3  ;;  %s315_s5 = sshll.u32 (!%p92_p9), %s377_s4, 4  ;;  %s316_s5 = int_to_ptr.vmem [resolvable:$false] %s315_s5 }
  0x14   : > { %s317_s10 = scalar_lea.vmem (!%p92_p9), %s316_s5, 1024  ;;  %p318_p0 = scmp.lt.s32.totalorder (!%p92_p9), %s444_s26, %s316_s5 }
  0x15   : > { %s501_s18 = smov (!%p112_p10, %s251_s18), 3  ;;  %p313_p12 = pnand %p312_p11, %p428_p5 }
  0x16   : > { %s252_s19 = sshll.u32 %s501_s18, 3  ;;  %p319_p1 = scmp.lt.s32.totalorder %s317_s10, %s311_s3 }
  0x17   : > { %s115_s22 = scalar_lea.vmem %s492_s0, %s252_s19  ;;  %p314_p13 = pneg %p313_p12 }
  0x18   : > { %v118_v1 = vld [vmem:[%s115_s22] sm:$0xff]  ;;  %v119_v2 = vld [vmem:[%s115_s22 + $0x8] sm:$0xff]  ;;  %p320_p2 = por %p319_p1, %p318_p0 }
  0x19   : > { %v121_v3 = vsub.s32 0, %v118_v1  ;;  %v128_v4 = vsub.s32 0, %v119_v2  ;;  %vm120_vm0 = vcmp.lt.s32.totalorder %v118_v1, 0  ;;  %vm127_vm1 = vcmp.lt.s32.totalorder %v119_v2, 0 }
  0x1a   : > { %p321_p3 = pnand %p320_p2, %p314_p13 }
  0x1b   : > { %v253_v5 = vmin.u32 %v121_v3, %v118_v1  ;;  %v254_v6 = vmin.u32 %v128_v4, %v119_v2 }
  0x1d   : > { %v124_v7 = vand.u32 255, %v253_v5  ;;  %v131_v8 = vand.u32 255, %v254_v6 }
  0x1f   : > { %v125_v9 = vsub.s32 0, %v124_v7  ;;  %v132_v10 = vsub.s32 0, %v131_v8 }
  0x21   : > { %v126_v11 = vsel %vm120_vm0, %v125_v9, %v124_v7  ;;  %v133_v12 = vsel %vm127_vm1, %v132_v10, %v131_v8 }
  0x22   : > { %vm134_vm2 = vcmp.ne.s32.totalorder %v126_v11, 0  ;;  %vm136_vm3 = vcmp.lt.s32.totalorder %v126_v11, 0  ;;  %v140_v13 = vadd.s32 256, %v126_v11  ;;  %vm135_vm4 = vcmp.ne.s32.totalorder %v133_v12, 0 }
  0x23   : > { %vm138_vm5 = vmand %vm136_vm3, %vm134_vm2  ;;  %vm137_vm6 = vcmp.lt.s32.totalorder %v133_v12, 0  ;;  %v141_v14 = vadd.s32 256, %v133_v12 }
  0x24   : > { %v142_v15 = vsel %vm138_vm5, %v140_v13, %v126_v11  ;;  %vm139_vm7 = vmand %vm137_vm6, %vm135_vm4 }
  0x25   : > { %148 = vperm.xlu0 %310, %v142_v15   ;;  %v143_v16 = vsel %vm139_vm7, %v141_v14, %v133_v12 }
  0x29   : > { %151 = vperm.xlu0 %310, %v143_v16  }
  0xa4   : > { %v149_v20 = vpop.permute.xlu0 %148 }
  0xa5   : > { %vm153_vm8 = vcmp.eq.s32.totalorder %v149_v20, %v145_v18  ;;  %vm154_vm9 = vcmp.eq.s32.totalorder %v149_v20, %v146_v19 }
  0xa6   : > { %v255_v22 = vsel %vm153_vm8, 1.0, %v376_v21  ;;  %v256_v23 = vsel %vm154_vm9, 1.0, %v376_v21 }
  0xa7   : > { %165 = vst [vmem:[%s110_s25] sm:$0xff] %v255_v22  ;;  %166 = vst [vmem:[%s110_s25 + $0x8] sm:$0xff] %v256_v23 }
  0xa8   : > { %v152_v24 = vpop.permute.xlu0 %151 }
  0xa9   : > { %vm155_vm10 = vcmp.eq.s32.totalorder %v152_v24, %v145_v18  ;;  %vm156_vm11 = vcmp.eq.s32.totalorder %v152_v24, %v146_v19 }
  0xaa   : > { %v257_v25 = vsel %vm155_vm10, 1.0, %v376_v21  ;;  %v258_v26 = vsel %vm156_vm11, 1.0, %v376_v21 }
  0xab   : > { %167 = vst [vmem:[%s110_s25 + $0x10] sm:$0xff] %v257_v25  ;;  %168 = vst [vmem:[%s110_s25 + $0x18] sm:$0xff] %v258_v26 }
  0xac   : > { %324 = shalt.err (!%p321_p3)
}
  0xad   : > { %s325_s11 = scalar_lea.hbm %s449_s30, 512  ;;  %s329_s18 = scalar_lea.hbm %s493_s1, 1024 }
  0xae   : > { %p326_p4 = scmp.ne.s32.totalorder %s449_s30, %s325_s11  ;;  %p330_p9 = scmp.lt.u32.totalorder %s449_s30, %s493_s1 }
  0xaf   : > { %p331_p10 = scmp.lt.u32.totalorder %s329_s18, %s325_s11  ;;  %p333_p12 = scmp.lt.u32.totalorder %s325_s11, %s449_s30 }
  0xb0   : > { %p327_p7 = pnand %p326_p4, %p428_p5 }
  0xb1   : > { %p332_p11 = por %p331_p10, %p330_p9 }
  0xb2   : > { %p328_p8 = pneg %p327_p7 }
  0xb3   : > { %p334_p13 = por %p333_p12, %p332_p11 }
  0xb5   : > { %p335_p0 = pnand %p334_p13, %p328_p8 }
  0xb7   : > { %338 = shalt.err (!%p335_p0)
}
  0xb8   : > { %s378_s21 = smov 256   ;;  %s379_s22 = smov 16  }
  0xb9   : > { %267 = dma.vmem_to_hbm [thread:$0]  (%p428_p5), %s444_s26, 512, %s449_s30, %s451_s2, %s378_s21, %s378_s21, %s379_s22  }
  0xba PF: > { %p273_p1 = scmp.ge.s32.totalorder %s373_s9, 2  ;;  %s199_s23 = sand.u32 1, %s361_s6  }
  0xbb   : > { %s200_s24 = scalar_lea.sflag [#allocation3], %s199_s23 }
  0xbc   : > { %p270_p2 = pnand %p273_p1, %p432_p6 }
  0xbe   : > { %356 = dma.done.wait (!%p270_p2), %s200_s24, 512  }
  0xbf   : > { %358 = vsyncadd (!%p270_p2), %s200_s24, 4294966784  ;;  %p11_p3 = scmp.ge.s32.totalorder %s415_s12, 4   ;;  %s496_s6 = smov %s365_s7 }
  0xc0   : > { %s497_s7 = smov %s369_s8  ;;  %s498_s8 = smov %s426_s15 }
  0xc1   : > { %s499_s9 = smov %s415_s12  ;;  %13 = sbr.rel (!%p11_p3) target bundleno = 3 (0x3), region = 59 }
  0xc8   :  { %205 = vsyncpa [#allocation3], 1 }
  0xc9   :  { %207 = vsyncpa [#allocation3 + $0x1], 1 }

</bundles_post_ra>
